<compile_context>
chip_gen: v7x
topology: tpu7x:2x2x1
jax: 0.10.0
libtpu: 0.0.40
codegen_flags: <defaults>
</compile_context>

<pallas_src>
import functools

import jax
import jax.numpy as jnp
from jax.experimental import pallas as pl
from jax.experimental.pallas import tpu as pltpu


def _bilinear_kernel(input_dim, hidden_dim, feature_dim, output_dim,
                     obs_ref, deltas_ref, w_ref, b_ref, out_ref):
    f32 = jnp.float32
    H = hidden_dim
    F = feature_dim
    O = output_dim
    OF = O * F

    x = obs_ref[...].astype(f32)          # (TB, input_dim)
    d = deltas_ref[...].astype(f32)       # (TB, 1)

    # ---- obs trunk (hidden_depth = 2): Linear+ReLU, Linear+ReLU ----
    h = jnp.maximum(
        jnp.dot(x, w_ref[0, :input_dim, :H], preferred_element_type=f32)
        + b_ref[0:1, :H], 0.0)
    h = jnp.maximum(
        jnp.dot(h, w_ref[1, :H, :H], preferred_element_type=f32)
        + b_ref[1:2, :H], 0.0)

    # ---- delta trunk: Linear(1,H/4)+ReLU (K=1 as broadcast), Linear+ReLU, Linear+ReLU ----
    hd = jnp.maximum(d * w_ref[2, :1, :H // 4] + b_ref[2:3, :H // 4], 0.0)
    hd = jnp.maximum(
        jnp.dot(hd, w_ref[3, :H // 4, :H // 2], preferred_element_type=f32)
        + b_ref[3:4, :H // 2], 0.0)
    hd = jnp.maximum(
        jnp.dot(hd, w_ref[4, :H // 2, :H], preferred_element_type=f32)
        + b_ref[4:5, :H], 0.0)

    # ---- fused final projections: [ob_emb | de_emb] = [h | hd] @ blockdiag(W3p, V4) ----
    hcat = jnp.concatenate([h, hd], axis=-1)                              # (TB, 2H)
    emb = (jnp.dot(hcat, w_ref[5, :2 * H, :2 * OF], preferred_element_type=f32)
           + b_ref[5:6, :2 * OF])                                         # (TB, 2*O*F)
    ob_emb = emb[:, :OF]      # obs final weight was column-permuted -> layout [f*O + o]
    de_emb = emb[:, OF:]      # natural delta layout is already         [f*O + o]

    # ---- bilinear diagonal: pred[:, o] = sum_f prod[:, f*O + o] ----
    prod = ob_emb * de_emb
    acc = prod[:, 0:O]
    for f in range(1, F):
        acc = acc + prod[:, f * O:(f + 1) * O]
    out_ref[...] = acc


def bilinear_predictor_scalar_delta(obs, deltas, obs_params, delta_params,
                                    *, feature_dim, output_dim, tile_b=512):
    """obs_params: 3 (W, b) pairs; delta_params: 4 (W, b) pairs; W stored as (in, out)."""
    f32 = jnp.float32
    (w1, b1), (w2, b2), (w3, b3) = obs_params
    (v1, c1), (v2, c2), (v3, c3), (v4, c4) = delta_params
    input_dim, hidden_dim = w1.shape
    OF = feature_dim * output_dim

    # Permute the obs-final Linear columns so its flat output is indexed [f*O + o]
    # (matching the natural delta-embedding layout).  Exact relabeling, no math change.
    w3p = (w3.reshape(hidden_dim, output_dim, feature_dim)
              .transpose(0, 2, 1).reshape(hidden_dim, OF))
    b3p = (b3.reshape(1, output_dim, feature_dim)
              .transpose(0, 2, 1).reshape(1, OF))

    # Fuse the two final projections into one block-diagonal matmul.
    wf = jnp.zeros((2 * hidden_dim, 2 * OF), f32)
    wf = wf.at[:hidden_dim, :OF].set(w3p.astype(f32))
    wf = wf.at[hidden_dim:, OF:].set(v4.astype(f32))
    bf = jnp.concatenate([b3p.astype(f32), c4.astype(f32)], axis=-1)

    weights = [w1, w2, v1, v2, v3, wf]
    biases = [b1, b2, c1, c2, c3, bf]

    # Pack everything into two zero-padded VMEM slabs (static slices in-kernel).
    max_r = max(w.shape[0] for w in weights)
    max_c = max(w.shape[1] for w in weights)
    w_slab = jnp.zeros((len(weights), max_r, max_c), f32)
    for i, w in enumerate(weights):
        w_slab = w_slab.at[i, :w.shape[0], :w.shape[1]].set(w.astype(f32))
    b_slab = jnp.zeros((len(biases), max_c), f32)
    for i, b in enumerate(biases):
        b_slab = b_slab.at[i, :b.shape[-1]].set(b.reshape(-1).astype(f32))

    # Batch tiling: pad B up to a multiple of the tile so every block is full.
    B = obs.shape[0]
    tb = min(tile_b, ((B + 7) // 8) * 8)
    n_tiles = pl.cdiv(B, tb)
    b_pad = n_tiles * tb
    if b_pad != B:
        obs = jnp.pad(obs, ((0, b_pad - B), (0, 0)))
        deltas = jnp.pad(deltas, ((0, b_pad - B), (0, 0)))

    kernel = functools.partial(_bilinear_kernel, input_dim, hidden_dim,
                               feature_dim, output_dim)
    out = pl.pallas_call(
        kernel,
        out_shape=jax.ShapeDtypeStruct((b_pad, output_dim), f32),
        grid=(n_tiles,),
        in_specs=[
            pl.BlockSpec((tb, input_dim), lambda i: (i, 0)),      # obs: pipelined per tile
            pl.BlockSpec((tb, 1), lambda i: (i, 0)),              # deltas: pipelined per tile
            pl.BlockSpec(w_slab.shape, lambda i: (0, 0, 0)),      # weights: VMEM-resident
            pl.BlockSpec(b_slab.shape, lambda i: (0, 0)),         # biases: VMEM-resident
        ],
        out_specs=pl.BlockSpec((tb, output_dim), lambda i: (i, 0)),
        compiler_params=pltpu.CompilerParams(
            dimension_semantics=("parallel",)),
    )(obs.astype(f32), deltas.astype(f32), w_slab, b_slab)
    return out[:B]


def _init_linear(key, fan_in, fan_out):
    """Deterministic PyTorch-style Linear init; weight stored as (in, out)."""
    kw, kb = jax.random.split(key)
    bound = 1.0 / (fan_in ** 0.5)
    w = jax.random.uniform(kw, (fan_in, fan_out), jnp.float32, -bound, bound)
    b = jax.random.uniform(kb, (1, fan_out), jnp.float32, -bound, bound)
    return w, b


def _reference(obs, deltas, obs_params, delta_params, feature_dim, output_dim):
    """Pure-JAX mirror of the PyTorch forward (unpermuted params)."""
    (w1, b1), (w2, b2), (w3, b3) = obs_params
    h = jnp.maximum(obs @ w1 + b1, 0.0)
    h = jnp.maximum(h @ w2 + b2, 0.0)
    ob_emb = (h @ w3 + b3).reshape(-1, output_dim, feature_dim)
    (v1, c1), (v2, c2), (v3, c3), (v4, c4) = delta_params
    d = jnp.maximum(deltas @ v1 + c1, 0.0)
    d = jnp.maximum(d @ v2 + c2, 0.0)
    d = jnp.maximum(d @ v3 + c3, 0.0)
    de_emb = (d @ v4 + c4).reshape(-1, feature_dim, output_dim)
    m = jnp.einsum("bof,bfp->bop", ob_emb, de_emb)
    return jnp.diagonal(m, axis1=1, axis2=2)


if __name__ == "__main__":
    B, input_dim, hidden_dim, feature_dim, output_dim, hidden_depth = 8, 32, 32, 8, 4, 2

    root = jax.random.PRNGKey(0)
    keys = jax.random.split(root, 9)

    # obs_trunk: Linear(in, H)+ReLU, Linear(H, H)+ReLU, Linear(H, F*O)
    obs_params = [
        _init_linear(keys[0], input_dim, hidden_dim),
        _init_linear(keys[1], hidden_dim, hidden_dim),
        _init_linear(keys[2], hidden_dim, feature_dim * output_dim),
    ]
    # delta_trunk: Linear(1, H/4)+ReLU, Linear(H/4, H/2)+ReLU,
    #              Linear(H/2, H)+ReLU, Linear(H, F*O)
    delta_params = [
        _init_linear(keys[3], 1, hidden_dim // 4),
        _init_linear(keys[4], hidden_dim // 4, hidden_dim // 2),
        _init_linear(keys[5], hidden_dim // 2, hidden_dim),
        _init_linear(keys[6], hidden_dim, feature_dim * output_dim),
    ]

    obs = jax.random.normal(keys[7], (B, input_dim), jnp.float32)
    deltas = jax.random.normal(keys[8], (B, 1), jnp.float32)

    pred = bilinear_predictor_scalar_delta(
        obs, deltas, obs_params, delta_params,
        feature_dim=feature_dim, output_dim=output_dim)
    pred = jax.block_until_ready(pred)

    ref = _reference(obs, deltas, obs_params, delta_params, feature_dim, output_dim)
    assert pred.shape == (B, output_dim), pred.shape
    assert jnp.allclose(pred, ref, atol=1e-4, rtol=1e-4), float(jnp.max(jnp.abs(pred - ref)))
    print("KERNEL_OK")
</pallas_src>

<mosaic_0001>
module attributes {stable_mosaic.version = 11 : i64} {
  func.func @_bilinear_kernel(%arg0: i32, %arg1: memref<8x32xf32, #tpu.memory_space<vmem>>, %arg2: memref<8x1xf32, #tpu.memory_space<vmem>>, %arg3: memref<6x64x64xf32, #tpu.memory_space<vmem>>, %arg4: memref<6x64xf32, #tpu.memory_space<vmem>>, %arg5: memref<8x4xf32, #tpu.memory_space<vmem>>) attributes {dimension_semantics = [#tpu.dimension_semantics<parallel>], iteration_bounds = array<i64: 1>, scalar_prefetch = 0 : i64, scratch_operands = 0 : i64, tpu.core_type = #tpu.core_type<tc>, window_params = [{transform_indices = @transform_0, window_bounds = array<i64: 8, 32>}, {transform_indices = @transform_1, window_bounds = array<i64: 8, 1>}, {pipeline_mode = #tpu.pipeline_mode<synchronous>, transform_indices = @transform_2, window_bounds = array<i64: 6, 64, 64>}, {pipeline_mode = #tpu.pipeline_mode<synchronous>, transform_indices = @transform_3, window_bounds = array<i64: 6, 64>}, {transform_indices = @transform_4, window_bounds = array<i64: 8, 4>}]} {
    %c0 = arith.constant 0 : index
    %c0_0 = arith.constant 0 : index
    %0 = vector.load %arg1[%c0, %c0_0] : memref<8x32xf32, #tpu.memory_space<vmem>>, vector<8x32xf32>
    %c0_1 = arith.constant 0 : index
    %c0_2 = arith.constant 0 : index
    %1 = vector.load %arg2[%c0_1, %c0_2] : memref<8x1xf32, #tpu.memory_space<vmem>>, vector<8x1xf32>
    %c0_3 = arith.constant 0 : index
    %c0_4 = arith.constant 0 : index
    %c0_5 = arith.constant 0 : index
    %2 = vector.load %arg3[%c0_3, %c0_4, %c0_5] : memref<6x64x64xf32, #tpu.memory_space<vmem>>, vector<1x32x32xf32>
    %3 = vector.shape_cast %2 : vector<1x32x32xf32> to vector<32x32xf32>
    %cst = arith.constant dense<0.000000e+00> : vector<8x32xf32>
    %4 = tpu.matmul %0, %3, %cst {dimension_numbers = #tpu.dot_dimension_numbers<[1], [0], [0], [1], [0, 0, 1, 1], [], []>} : vector<8x32xf32>, vector<32x32xf32>, vector<8x32xf32> -> vector<8x32xf32>
    %c0_6 = arith.constant 0 : index
    %c0_7 = arith.constant 0 : index
    %5 = vector.load %arg4[%c0_6, %c0_7] : memref<6x64xf32, #tpu.memory_space<vmem>>, vector<1x32xf32>
    %6 = vector.broadcast %5 : vector<1x32xf32> to vector<8x32xf32>
    %7 = arith.addf %4, %6 : vector<8x32xf32>
    %cst_8 = arith.constant 0.000000e+00 : f32
    %8 = vector.broadcast %cst_8 : f32 to vector<8x32xf32>
    %9 = arith.maximumf %7, %8 : vector<8x32xf32>
    %c1 = arith.constant 1 : index
    %c0_9 = arith.constant 0 : index
    %c0_10 = arith.constant 0 : index
    %10 = vector.load %arg3[%c1, %c0_9, %c0_10] : memref<6x64x64xf32, #tpu.memory_space<vmem>>, vector<1x32x32xf32>
    %11 = vector.shape_cast %10 : vector<1x32x32xf32> to vector<32x32xf32>
    %cst_11 = arith.constant dense<0.000000e+00> : vector<8x32xf32>
    %12 = tpu.matmul %9, %11, %cst_11 {dimension_numbers = #tpu.dot_dimension_numbers<[1], [0], [0], [1], [0, 0, 1, 1], [], []>} : vector<8x32xf32>, vector<32x32xf32>, vector<8x32xf32> -> vector<8x32xf32>
    %c1_12 = arith.constant 1 : index
    %c0_13 = arith.constant 0 : index
    %13 = vector.load %arg4[%c1_12, %c0_13] : memref<6x64xf32, #tpu.memory_space<vmem>>, vector<1x32xf32>
    %14 = vector.broadcast %13 : vector<1x32xf32> to vector<8x32xf32>
    %15 = arith.addf %12, %14 : vector<8x32xf32>
    %cst_14 = arith.constant 0.000000e+00 : f32
    %16 = vector.broadcast %cst_14 : f32 to vector<8x32xf32>
    %17 = arith.maximumf %15, %16 : vector<8x32xf32>
    %c2 = arith.constant 2 : index
    %c0_15 = arith.constant 0 : index
    %c0_16 = arith.constant 0 : index
    %18 = vector.load %arg3[%c2, %c0_15, %c0_16] : memref<6x64x64xf32, #tpu.memory_space<vmem>>, vector<1x1x8xf32>
    %19 = vector.shape_cast %18 : vector<1x1x8xf32> to vector<1x8xf32>
    %20 = vector.broadcast %1 : vector<8x1xf32> to vector<8x8xf32>
    %21 = vector.broadcast %19 : vector<1x8xf32> to vector<8x8xf32>
    %22 = arith.mulf %20, %21 : vector<8x8xf32>
    %c2_17 = arith.constant 2 : index
    %c0_18 = arith.constant 0 : index
    %23 = vector.load %arg4[%c2_17, %c0_18] : memref<6x64xf32, #tpu.memory_space<vmem>>, vector<1x8xf32>
    %24 = vector.broadcast %23 : vector<1x8xf32> to vector<8x8xf32>
    %25 = arith.addf %22, %24 : vector<8x8xf32>
    %cst_19 = arith.constant 0.000000e+00 : f32
    %26 = vector.broadcast %cst_19 : f32 to vector<8x8xf32>
    %27 = arith.maximumf %25, %26 : vector<8x8xf32>
    %c3 = arith.constant 3 : index
    %c0_20 = arith.constant 0 : index
    %c0_21 = arith.constant 0 : index
    %28 = vector.load %arg3[%c3, %c0_20, %c0_21] : memref<6x64x64xf32, #tpu.memory_space<vmem>>, vector<1x8x16xf32>
    %29 = vector.shape_cast %28 : vector<1x8x16xf32> to vector<8x16xf32>
    %cst_22 = arith.constant dense<0.000000e+00> : vector<8x16xf32>
    %30 = tpu.matmul %27, %29, %cst_22 {dimension_numbers = #tpu.dot_dimension_numbers<[1], [0], [0], [1], [0, 0, 1, 1], [], []>} : vector<8x8xf32>, vector<8x16xf32>, vector<8x16xf32> -> vector<8x16xf32>
    %c3_23 = arith.constant 3 : index
    %c0_24 = arith.constant 0 : index
    %31 = vector.load %arg4[%c3_23, %c0_24] : memref<6x64xf32, #tpu.memory_space<vmem>>, vector<1x16xf32>
    %32 = vector.broadcast %31 : vector<1x16xf32> to vector<8x16xf32>
    %33 = arith.addf %30, %32 : vector<8x16xf32>
    %cst_25 = arith.constant 0.000000e+00 : f32
    %34 = vector.broadcast %cst_25 : f32 to vector<8x16xf32>
    %35 = arith.maximumf %33, %34 : vector<8x16xf32>
    %c4 = arith.constant 4 : index
    %c0_26 = arith.constant 0 : index
    %c0_27 = arith.constant 0 : index
    %36 = vector.load %arg3[%c4, %c0_26, %c0_27] : memref<6x64x64xf32, #tpu.memory_space<vmem>>, vector<1x16x32xf32>
    %37 = vector.shape_cast %36 : vector<1x16x32xf32> to vector<16x32xf32>
    %cst_28 = arith.constant dense<0.000000e+00> : vector<8x32xf32>
    %38 = tpu.matmul %35, %37, %cst_28 {dimension_numbers = #tpu.dot_dimension_numbers<[1], [0], [0], [1], [0, 0, 1, 1], [], []>} : vector<8x16xf32>, vector<16x32xf32>, vector<8x32xf32> -> vector<8x32xf32>
    %c4_29 = arith.constant 4 : index
    %c0_30 = arith.constant 0 : index
    %39 = vector.load %arg4[%c4_29, %c0_30] : memref<6x64xf32, #tpu.memory_space<vmem>>, vector<1x32xf32>
    %40 = vector.broadcast %39 : vector<1x32xf32> to vector<8x32xf32>
    %41 = arith.addf %38, %40 : vector<8x32xf32>
    %cst_31 = arith.constant 0.000000e+00 : f32
    %42 = vector.broadcast %cst_31 : f32 to vector<8x32xf32>
    %43 = arith.maximumf %41, %42 : vector<8x32xf32>
    %44 = tpu.concatenate %17, %43 in 1 : vector<8x32xf32>, vector<8x32xf32> -> vector<8x64xf32>
    %c5 = arith.constant 5 : index
    %c0_32 = arith.constant 0 : index
    %c0_33 = arith.constant 0 : index
    %45 = vector.load %arg3[%c5, %c0_32, %c0_33] : memref<6x64x64xf32, #tpu.memory_space<vmem>>, vector<1x64x64xf32>
    %46 = vector.shape_cast %45 : vector<1x64x64xf32> to vector<64x64xf32>
    %cst_34 = arith.constant dense<0.000000e+00> : vector<8x64xf32>
    %47 = tpu.matmul %44, %46, %cst_34 {dimension_numbers = #tpu.dot_dimension_numbers<[1], [0], [0], [1], [0, 0, 1, 1], [], []>} : vector<8x64xf32>, vector<64x64xf32>, vector<8x64xf32> -> vector<8x64xf32>
    %c5_35 = arith.constant 5 : index
    %c0_36 = arith.constant 0 : index
    %48 = vector.load %arg4[%c5_35, %c0_36] : memref<6x64xf32, #tpu.memory_space<vmem>>, vector<1x64xf32>
    %49 = vector.broadcast %48 : vector<1x64xf32> to vector<8x64xf32>
    %50 = arith.addf %47, %49 : vector<8x64xf32>
    %51 = vector.extract_strided_slice %50 {offsets = [0, 0], sizes = [8, 32], strides = [1, 1]} : vector<8x64xf32> to vector<8x32xf32>
    %52 = vector.extract_strided_slice %50 {offsets = [0, 32], sizes = [8, 32], strides = [1, 1]} : vector<8x64xf32> to vector<8x32xf32>
    %53 = arith.mulf %51, %52 : vector<8x32xf32>
    %54 = vector.extract_strided_slice %53 {offsets = [0, 0], sizes = [8, 4], strides = [1, 1]} : vector<8x32xf32> to vector<8x4xf32>
    %55 = vector.extract_strided_slice %53 {offsets = [0, 4], sizes = [8, 4], strides = [1, 1]} : vector<8x32xf32> to vector<8x4xf32>
    %56 = arith.addf %54, %55 : vector<8x4xf32>
    %57 = vector.extract_strided_slice %53 {offsets = [0, 8], sizes = [8, 4], strides = [1, 1]} : vector<8x32xf32> to vector<8x4xf32>
    %58 = arith.addf %56, %57 : vector<8x4xf32>
    %59 = vector.extract_strided_slice %53 {offsets = [0, 12], sizes = [8, 4], strides = [1, 1]} : vector<8x32xf32> to vector<8x4xf32>
    %60 = arith.addf %58, %59 : vector<8x4xf32>
    %61 = vector.extract_strided_slice %53 {offsets = [0, 16], sizes = [8, 4], strides = [1, 1]} : vector<8x32xf32> to vector<8x4xf32>
    %62 = arith.addf %60, %61 : vector<8x4xf32>
    %63 = vector.extract_strided_slice %53 {offsets = [0, 20], sizes = [8, 4], strides = [1, 1]} : vector<8x32xf32> to vector<8x4xf32>
    %64 = arith.addf %62, %63 : vector<8x4xf32>
    %65 = vector.extract_strided_slice %53 {offsets = [0, 24], sizes = [8, 4], strides = [1, 1]} : vector<8x32xf32> to vector<8x4xf32>
    %66 = arith.addf %64, %65 : vector<8x4xf32>
    %67 = vector.extract_strided_slice %53 {offsets = [0, 28], sizes = [8, 4], strides = [1, 1]} : vector<8x32xf32> to vector<8x4xf32>
    %68 = arith.addf %66, %67 : vector<8x4xf32>
    %c0_37 = arith.constant 0 : index
    %c0_38 = arith.constant 0 : index
    %69 = vector.load %arg5[%c0_37, %c0_38] : memref<8x4xf32, #tpu.memory_space<vmem>>, vector<8x4xf32>
    tpu.vector_store %arg5[%c0_37, %c0_38], %68 {strides = array<i32>} : memref<8x4xf32, #tpu.memory_space<vmem>>, vector<8x4xf32>,
    return
  }
  func.func @transform_0(%arg0: i32) -> (i32, i32) {
    %c0_i32 = arith.constant 0 : i32
    %c0_i32_0 = arith.constant 0 : i32
    return %arg0, %c0_i32 : i32, i32
  }
  func.func @transform_1(%arg0: i32) -> (i32, i32) {
    %c0_i32 = arith.constant 0 : i32
    %c0_i32_0 = arith.constant 0 : i32
    return %arg0, %c0_i32 : i32, i32
  }
  func.func @transform_2(%arg0: i32) -> (i32, i32, i32) {
    %c0_i32 = arith.constant 0 : i32
    %c0_i32_0 = arith.constant 0 : i32
    %c0_i32_1 = arith.constant 0 : i32
    %c0_i32_2 = arith.constant 0 : i32
    return %c0_i32, %c0_i32_0, %c0_i32_1 : i32, i32, i32
  }
  func.func @transform_3(%arg0: i32) -> (i32, i32) {
    %c0_i32 = arith.constant 0 : i32
    %c0_i32_0 = arith.constant 0 : i32
    %c0_i32_1 = arith.constant 0 : i32
    return %c0_i32, %c0_i32_0 : i32, i32
  }
  func.func @transform_4(%arg0: i32) -> (i32, i32) {
    %c0_i32 = arith.constant 0 : i32
    %c0_i32_0 = arith.constant 0 : i32
    return %arg0, %c0_i32 : i32, i32
  }
}

</mosaic_0001>

<bundles_post_ra>
// kernel: tpu_custom_call.1
= control target key start
LH: loop header
LB: loop body
LE: loop exit
PB: predicated region body
PF: predicated region fallthrough
CT: control target
= control target key end

     0   :  { %9 = vsyncpa [#allocation3], 0  ;;  %s676_s15 = smov [#allocation2]   ;;  %s773_s0 = inlined_call_operand.vmem [shape: f32[8,32], index: 0, kind: input, shape index: {}]   ;;  %s774_s1 = inlined_call_operand.vmem [shape: f32[8,1], index: 1, kind: input, shape index: {}]   ;;  %s775_s2 = inlined_call_operand.hbm [shape: f32[6,64,64], index: 2, kind: input, shape index: {}]   ;;  %s776_s3 = inlined_call_operand.vmem [shape: f32[6,64], index: 3, kind: input, shape index: {}]   ;;  %s777_s4 = inlined_call_operand.vmem [shape: f32[8,4], index: 4, kind: output, shape index: {}]  }
   0x1   :  { %s19_s16 = sshll.u32 %s676_s15, 4  ;;  %s652_s19 = scalar_lea.hbm %s775_s2, 6144  ;;  %s20_s16 = int_to_ptr.vmem [resolvable:$true] %s19_s16 }
   0x2   :  { %p653_p0 = scmp.ne.s32.totalorder %s775_s2, %s652_s19  ;;  %p656_p1 = scmp.lt.u32.totalorder %s652_s19, %s775_s2 }
   0x4   :  { %p658_p2 = pnand %p656_p1, %p653_p0 }
   0x6   :  { %661 = shalt.err (!%p658_p2)
}
   0x7   :  { %s662_s24 = scalar_lea.vmem %s20_s16, 6144  ;;  %p667_p4 = scmp.lt.s32.totalorder %s20_s16, %s20_s16 }
   0x8   :  { %p663_p3 = scmp.ne.s32.totalorder %s20_s16, %s662_s24  ;;  %p668_p5 = scmp.lt.s32.totalorder %s662_s24, %s662_s24 }
   0xa   :  { %p669_p6 = por %p668_p5, %p667_p4 }
   0xc   :  { %p670_p7 = pnand %p669_p6, %p663_p3 }
   0xe   :  { %673 = shalt.err (!%p670_p7)
}
   0xf   :  { %s677_s25 = smov 128   ;;  %s678_s26 = smov 8  }
  0x10   :  { %25 = dma.hbm_to_vmem [thread:$0]  %s775_s2, 6144, %s20_s16, [#allocation3], %s677_s25, %s677_s25, %s678_s26  }
  0x11   :  { %674 = dma.done.wait [#allocation3], 6144  }
  0x12   :  { %675 = vsyncadd [#allocation3], 4294961152  ;;  %v679_v0 = vmov 0   ;;  %v680_v1 = vmov 0.0|0.0   ;;  %v32_v2 = vld [vmem:[%s774_s1] sm:$0xff]  ;;  %v34_v4 = vld [vmem:[#allocation2 + $0x8] sm:$0xff] }
  0x13   :  { %651 = vset.pattern.permute.xlu0 %v679_v0  ;;  %608 = vmatprep.subr.bf16.mxu1 %v680_v1  ;;  %v33_v3 = vld [vmem:[#allocation2] sm:$0xff]  ;;  %v35_v6 = vld [vmem:[#allocation2 + $0x10] sm:$0xff]  ;;  %v36_v7 = vld [vmem:[#allocation2 + $0x18] sm:$0xff]  ;;  %vm681_vm0 = vmmov 0   ;;  %v682_v8 = vmov 0.0   ;;  %vm42_vm1 = vcmask 261120  }
  0x14   :  { %205 = vperm.xlu0 %651, %v32_v2   ;;  %v609_v5 = vpack.c.bf16 %v34_v4, %v33_v3  ;;  %563 = vmatprep.mubr.msk.f32.mxu1 %vm681_vm0, %v682_v8  ;;  %v612_v9 = vpack.c.bf16 %v36_v7, %v35_v6  ;;  %v221_v10 = vld [vmem:[#allocation2 + $0xc0] sm:$0xff]  ;;  %v119_v13 = vld [vmem:[#allocation2 + $0x48] sm:$0xff]  ;;  %v120_v15 = vld [vmem:[#allocation2 + $0x50] sm:$0xff]  ;;  %vm227_vm2 = vcmask 64512   ;;  %vm310_vm3 = vcmask 130048   ;;  %s683_s12 = smov 32  }
  0x15   :  { %577 = vmatprep.subr.mxu0 %v682_v8  ;;  %579 = vmatprep.mubr.msk.f32.mxu0 %vm681_vm0, %v682_v8  ;;  %v31_v11 = vld [vmem:[%s773_s0] sm:$0xff]  ;;  %v121_v16 = vld [vmem:[#allocation2 + $0x58] sm:$0xff]  ;;  %v304_v26 = vld [vmem:[#allocation2 + $0x108] sm:$0xff]  ;;  %vm404_vm4 = vcmask 523264   ;;  %s684_s17 = smov 96   ;;  %s685_s18 = smov 120  }
  0x16   :  { %610 = vmatpush3.bf16.msra.mxu1 %v609_v5  ;;  %578 = vmatpush3.msra.mxu0 %v221_v10  ;;  %v118_v12 = vld [vmem:[#allocation2 + $0x40] sm:$0xff]  ;;  %v618_v17 = vpack.c.bf16 %v121_v16, %v120_v15  ;;  %v392_v40 = vld [vmem:[#allocation2 + $0x148] sm:$0xff]  ;;  %v393_v41 = vld [vmem:[#allocation2 + $0x150] sm:$0xff]  ;;  %s686_s19 = smov 124   ;;  %s687_s20 = smov 112   ;;  %vm512_vm5 = vcmask 31744  }
  0x17   :  { %611 = vmatprep.subr.bf16.mxu1 %v680_v1  ;;  %623 = vmatprep.subr.bf16.mxu0 %v680_v1  ;;  %v615_v14 = vpack.c.bf16 %v119_v13, %v118_v12  ;;  %v523_v18 = vld [vmem:[#allocation2 + $0x80] ss:$0 sm:$0xff]  ;;  %v524_v19 = vld [vmem:[%s776_s3 + $0x2] ss:$0 sm:$0xff]  ;;  %v525_v32 = vld [vmem:[%s776_s3 + $0x3] ss:$0 sm:$0xff] }
  0x18   :  { %v519_v24 = vld [vmem:[%s776_s3] ss:$0 sm:$0xff]  ;;  %v394_v43 = vld [vmem:[#allocation2 + $0x158] sm:$0xff]  ;;  %v396_v46 = vld [vmem:[#allocation2 + $0x168] sm:$0xff]  ;;  %s688_s21 = smov 116   ;;  %s689_s22 = smov 104  }
  0x19   :  { %v303_v25 = vld [vmem:[#allocation2 + $0x100] sm:$0xff]  ;;  %v627_v44 = vpack.c.bf16 %v394_v43, %v393_v41  ;;  %v397_v48 = vld [vmem:[#allocation2 + $0x170] sm:$0xff]  ;;  %v398_v49 = vld [vmem:[#allocation2 + $0x178] sm:$0xff]  ;;  %s690_s23 = smov 108  }
  0x1a   :  { %613 = vmatpush3.bf16.msra.mxu1 %v612_v9  ;;  %v621_v30 = vpack.c.bf16 %v304_v26, %v303_v25  ;;  %v391_v39 = vld [vmem:[#allocation2 + $0x140] sm:$0xff]  ;;  %v633_v50 = vpack.c.bf16 %v398_v49, %v397_v48 }
  0x1b   :  { %614 = vmatprep.subr.bf16.mxu1 %v680_v1  ;;  %v624_v42 = vpack.c.bf16 %v392_v40, %v391_v39  ;;  %v395_v45 = vld [vmem:[#allocation2 + $0x160] sm:$0xff] }
  0x1c   :  { %v630_v47 = vpack.c.bf16 %v396_v46, %v395_v45  ;;  %v527_v51 = vld [vmem:[%s776_s3 + $0x4] ss:$0 sm:$0xff]  ;;  %v521_v56 = vld [vmem:[%s776_s3 + $0x1] ss:$0 sm:$0xff]  ;;  %v529_v61 = vld [vmem:[%s776_s3 + $0x5] ss:$0 sm:$0xff] }
  0x1d   :  { %564 = vmatmul.mubr.msk.f32.vlgmr.msra.gmra.mrb[0].mxu1 %vm42_vm1, %v31_v11  ;;  %s691_s3 = smov 100  }
  0x1e   :  { %616 = vmatpush3.bf16.msra.mxu1 %v615_v14  ;;  %574 = vmatprep.mubr.msk.f32.mxu1 %vm681_vm0, %v682_v8 }
  0x1f   :  { %617 = vmatprep.subr.bf16.mxu1 %v680_v1 }
  0x22   :  { %619 = vmatpush3.bf16.msra.mxu1 %v618_v17 }
  0x23   :  { %620 = vmatprep.subr.bf16.mxu1 %v680_v1 }
  0x93   :  { %v206_v20 = vpop.permute.xlu0 %205 }
  0x94   :  { %v212_v21 = vmul.f32 %v523_v18, %v206_v20 }
  0x96   :  { %v218_v22 = vadd.f32 %v524_v19, %v212_v21 }
  0x98   :  { %v219_v23 = vmax.f32 %v218_v22, 0.0 }
  0x9a   :  { %580 = vmatmul.mubr.msk.f32.vlgmr.msra.gmra.mrb[0].mxu0 %vm227_vm2, %v219_v23 }
  0x9b   :  { %605 = vmatprep.mubr.msk.f32.mxu0 %vm681_vm0, %v682_v8  ;;  %625 = vmatpush3.bf16.msra.mxu0 %v624_v42 }
  0x9c   :  { %626 = vmatprep.subr.bf16.mxu0 %v680_v1 }
  0x9f   :  { %628 = vmatpush3.bf16.msra.mxu0 %v627_v44 }
  0xa0   :  { %629 = vmatprep.subr.bf16.mxu0 %v680_v1 }
  0xa3   :  { %631 = vmatpush3.bf16.msra.mxu0 %v630_v47 }
  0xa4   :  { %632 = vmatprep.subr.bf16.mxu0 %v680_v1 }
  0xa7   :  { %634 = vmatpush3.bf16.msra.mxu0 %v633_v50 }
  0xf0   :  { %v112_v27 = vpop.f32.mrb[0].mxu1 }
  0xf1   :  { %v113_v28 = vadd.f32 %v519_v24, %v112_v27  ;;  %v565_v29 = vpop.f32.mrb[1].mxu1 }
  0xf3   :  { %v116_v31 = vmax.f32 %v113_v28, 0.0 }
  0xf5   :  { %575 = vmatmul.mubr.msk.f32.vlgmr.msra.gmra.mrb[2].mxu1 %vm42_vm1, %v116_v31 }
  0xf6   :  { %622 = vmatpush3.bf16.msra.mxu1 %v621_v30  ;;  %586 = vmatprep.mubr.msk.f32.mxu1 %vm681_vm0, %v682_v8 }
 0x16d   :  { %v297_v33 = vpop.f32.mrb[0].mxu0 }
 0x16e   :  { %v298_v34 = vadd.f32 %v525_v32, %v297_v33  ;;  %v581_v35 = vpop.f32.mrb[1].mxu0 }
 0x170   :  { %v301_v36 = vmax.f32 %v298_v34, 0.0 }
 0x172   :  { %587 = vmatmul.mubr.msk.f32.vlgmr.msra.gmra.mrb[4].mxu1 %vm310_vm3, %v301_v36 }
 0x1c8   :  { %v196_v37 = vpop.f32.mrb[2].mxu1 }
 0x1c9   :  { %v576_v38 = vpop.f32.mrb[3].mxu1  ;;  %v197_v57 = vadd.f32 %v521_v56, %v196_v37 }
 0x1cb   :  { %v200_v58 = vmax.f32 %v197_v57, 0.0 }
 0x245   :  { %v380_v52 = vpop.f32.mrb[4].mxu1 }
 0x246   :  { %v381_v53 = vadd.f32 %v527_v51, %v380_v52  ;;  %v588_v54 = vpop.f32.mrb[5].mxu1 }
 0x248   :  { %v384_v55 = vmax.f32 %v381_v53, 0.0 }
 0x24a   :  { %386 = vrot.lane.b32.xlu0 %v384_v55, %s683_s12 }
 0x2bc   :  { %v387_v59 = vpop.permute.xlu0 %386 }
 0x2bd   :  { %v389_v60 = vsel %vm42_vm1, %v200_v58, %v387_v59 }
 0x2be   :  { %606 = vmatmul.mubr.msk.f32.vlgmr.msra.gmra.mrb[2].mxu0 %vm404_vm4, %v389_v60 }
 0x391   :  { %v474_v62 = vpop.f32.mrb[2].mxu0 }
 0x392   :  { %v475_v63 = vadd.f32 %v529_v61, %v474_v62  ;;  %v607_v0 = vpop.f32.mrb[3].mxu0 }
 0x394   :  { %479 = vrot.lane.b32.xlu1 %v475_v63, %s684_s17 }
 0x406   :  { %v480_v1 = vpop.permute.xlu1 %479 }
 0x407   :  { %v482_v2 = vmul.f32 %v480_v1, %v475_v63 }
 0x409   :  { %488 = vrot.lane.b32.xlu0 %v482_v2, %s685_s18  ;;  %484 = vrot.lane.b32.xlu1 %v482_v2, %s686_s19 }
 0x40d   :  { %496 = vrot.lane.b32.xlu0 %v482_v2, %s687_s20  ;;  %492 = vrot.lane.b32.xlu1 %v482_v2, %s688_s21 }
 0x411   :  { %504 = vrot.lane.b32.xlu0 %v482_v2, %s689_s22  ;;  %500 = vrot.lane.b32.xlu1 %v482_v2, %s690_s23 }
 0x415   :  { %508 = vrot.lane.b32.xlu1 %v482_v2, %s691_s3 }
 0x47b   :  { %v489_v3 = vpop.permute.xlu0 %488  ;;  %v485_v4 = vpop.permute.xlu1 %484 }
 0x47c   :  { %v487_v5 = vadd.f32 %v485_v4, %v482_v2 }
 0x47e   :  { %v491_v6 = vadd.f32 %v489_v3, %v487_v5 }
 0x47f   :  { %v497_v7 = vpop.permute.xlu0 %496  ;;  %v493_v8 = vpop.permute.xlu1 %492 }
 0x480   :  { %v495_v9 = vadd.f32 %v493_v8, %v491_v6 }
 0x482   :  { %v499_v10 = vadd.f32 %v497_v7, %v495_v9 }
 0x483   :  { %v501_v11 = vpop.permute.xlu1 %500  ;;  %v505_v13 = vpop.permute.xlu0 %504 }
 0x484   :  { %v503_v12 = vadd.f32 %v501_v11, %v499_v10 }
 0x486   :  { %v507_v14 = vadd.f32 %v505_v13, %v503_v12 }
 0x487   :  { %v509_v15 = vpop.permute.xlu1 %508 }
 0x488   :  { %v511_v16 = vadd.f32 %v509_v15, %v507_v14 }
 0x48a   :  { %513 = vst.msk [vmem:[%s777_s4] sm:$0xff] %vm512_vm5, %v511_v16 }
 0x48b   :  { %518 = vsyncpa [#allocation3], 1 }

</bundles_post_ra>
